<compile_context>
chip_gen: v7x
topology: tpu7x:2x2x1
jax: 0.10.0
libtpu: 0.0.40
codegen_flags: <defaults>
</compile_context>

<pallas_src>
import functools

import numpy as np
import jax
import jax.numpy as jnp
from jax.experimental import pallas as pl
from jax.experimental.pallas import tpu as pltpu

_HALO = 128  # lanes of the next time-block made visible for the window shifts (>= W - 1)


def gaussian_weights(window_size: int, std_dev: float) -> jnp.ndarray:
    """Same construction as the PyTorch __init__ (CDF differences, normalized)."""
    interval = (2.0 * std_dev + 1.0) / window_size
    x = jnp.linspace(
        -std_dev - interval / 2.0,
        std_dev + interval / 2.0,
        window_size + 1,
        dtype=jnp.float32,
    )
    cdf = jax.scipy.stats.norm.cdf(x, loc=0.0, scale=std_dev)
    k = jnp.diff(cdf)
    return (k / jnp.sum(k)).astype(jnp.float32)


def _gma_block_kernel(vm_ref, vh_ref, o_ref, *, weights):
    # vm_ref: (1, 1, T)    f32 VMEM -- current time-block of the padded value stream (may hold NaN)
    # vh_ref: (1, 1, HALO) f32 VMEM -- first HALO elements of the *next* time-block (window halo)
    # o_ref : (1, 1, T)    f32 VMEM -- GMA outputs for the T steps of this block
    # weights: tuple of W python floats (compile-time constants, oldest -> newest)
    W = len(weights)
    T = vm_ref.shape[2]

    x = jnp.concatenate([vm_ref[0], vh_ref[0]], axis=1)      # (1, T + HALO), lane-aligned concat
    nan = jnp.isnan(x)
    clean = jnp.where(nan, 0.0, x)                            # values with NaN -> 0
    valid = jnp.where(nan, 0.0, 1.0)                          # 1.0 where a real value is present

    total = jnp.zeros((1, T), jnp.float32)                    # window sum of valid values
    count = jnp.zeros((1, T), jnp.float32)                    # window count of valid values
    wsum = jnp.zeros((1, T), jnp.float32)                     # sum_i w[i] * clean[t+i]
    winvalid = jnp.zeros((1, T), jnp.float32)                 # sum_i w[i] * (1 - valid[t+i])
    for i in range(W):                                        # static, fully unrolled (W is tiny)
        c_i = clean[:, i:i + T]                               # shifted window view (VPU copy/shift)
        v_i = valid[:, i:i + T]
        w_i = weights[i]
        total = total + c_i
        count = count + v_i
        wsum = wsum + w_i * c_i
        winvalid = winvalid + w_i * (1.0 - v_i)

    # nanmean of the window; NaN iff the whole window is missing (matches torch/np nanmean).
    mean = total / count
    # dot(weights, filled) with filled = where(valid, x, mean), folded so no per-step reduction.
    o_ref[0] = wsum + mean * winvalid


def gma_forward(new_values, weights, init_window=None, *, window_size, block_steps=512):
    """Run len(new_values) GMA forward() steps.

    Returns (outputs[num_steps], final data_window (W,) with NaNs preserved)."""
    W = int(window_size)
    T = int(block_steps)
    assert T % 128 == 0
    assert W - 1 <= _HALO, "window_size must be <= 129 for the fixed halo width"
    n = int(new_values.shape[0])
    assert n >= 1

    x = new_values.astype(jnp.float32)
    if init_window is None:
        # Module reset state: data_window full of NaN.
        init_window = jnp.full((W,), jnp.nan, jnp.float32)
    init_window = init_window.astype(jnp.float32)

    # Virtual stream: the data_window after step t is exactly stream[t : t + W] (oldest -> newest).
    stream = jnp.concatenate([init_window[1:], x])            # (n + W - 1,)

    nb = max(1, (n + T - 1) // T)                             # number of output blocks
    padded_len = (nb + 1) * T                                 # +1 block so the halo view is in-bounds
    stream_p = jnp.pad(stream, (0, padded_len - stream.shape[0]))
    stream_3d = stream_p.reshape(nb + 1, 1, T)

    w_host = tuple(float(v) for v in np.asarray(weights, dtype=np.float32))
    kernel = functools.partial(_gma_block_kernel, weights=w_host)

    out = pl.pallas_call(
        kernel,
        grid=(nb,),
        in_specs=[
            pl.BlockSpec((1, 1, T), lambda b: (b, 0, 0)),         # current time block
            pl.BlockSpec((1, 1, _HALO), lambda b: (b + 1, 0, 0)),  # halo: head of next block
        ],
        out_specs=pl.BlockSpec((1, 1, T), lambda b: (b, 0, 0)),    # lane-dense block store
        out_shape=jax.ShapeDtypeStruct((nb, 1, T), jnp.float32),
        compiler_params=pltpu.CompilerParams(
            dimension_semantics=("parallel",)),                    # blocks are independent
    )(stream_3d, stream_3d)

    outputs = out.reshape(nb * T)[:n]
    # Exact PyTorch data_window after the last step (NaNs preserved) -- allows chaining.
    final_window = stream[n - 1: n - 1 + W]
    return outputs, final_window


def reference_gma(new_values, weights_np, window_size):
    """Pure NumPy reference mirroring the PyTorch module exactly."""
    win = np.full((window_size,), np.nan, dtype=np.float32)
    outs = []
    w = weights_np.astype(np.float32)
    for v in new_values:
        win = np.roll(win, -1)
        win[-1] = v
        mean = np.nanmean(win)
        filled = np.where(~np.isnan(win), win, mean).astype(np.float32)
        outs.append(float(np.dot(w, filled)))
    return np.asarray(outs, dtype=np.float32), win


if __name__ == "__main__":
    window_size = 5
    std_dev = 1.0
    num_steps = 8

    weights = gaussian_weights(window_size, std_dev)              # (W,)

    key = jax.random.PRNGKey(0)
    new_values = jax.random.normal(key, (num_steps,), dtype=jnp.float32)
    new_values = new_values.at[3].set(jnp.nan)                    # exercise the NaN / nanmean fill path

    outs, final_window = gma_forward(new_values, weights, window_size=window_size)
    jax.block_until_ready((outs, final_window))

    ref_outs, ref_window = reference_gma(np.asarray(new_values), np.asarray(weights), window_size)
    np.testing.assert_allclose(np.asarray(outs), ref_outs, rtol=1e-5, atol=1e-6)
    np.testing.assert_allclose(np.asarray(final_window), ref_window, equal_nan=True)

    print("KERNEL_OK")
</pallas_src>

<mosaic_0001>
module attributes {stable_mosaic.version = 11 : i64} {
  func.func @_gma_block_kernel(%arg0: i32, %arg1: memref<1x1x512xf32, #tpu.memory_space<vmem>>, %arg2: memref<1x1x128xf32, #tpu.memory_space<vmem>>, %arg3: memref<1x1x512xf32, #tpu.memory_space<vmem>>) attributes {dimension_semantics = [#tpu.dimension_semantics<parallel>], iteration_bounds = array<i64: 1>, scalar_prefetch = 0 : i64, scratch_operands = 0 : i64, tpu.core_type = #tpu.core_type<tc>, window_params = [{transform_indices = @transform_0, window_bounds = array<i64: 1, 1, 512>}, {transform_indices = @transform_1, window_bounds = array<i64: 1, 1, 128>}, {transform_indices = @transform_2, window_bounds = array<i64: 1, 1, 512>}]} {
    %c0 = arith.constant 0 : index
    %c0_0 = arith.constant 0 : index
    %c0_1 = arith.constant 0 : index
    %0 = vector.load %arg1[%c0, %c0_0, %c0_1] : memref<1x1x512xf32, #tpu.memory_space<vmem>>, vector<1x1x512xf32>
    %1 = vector.shape_cast %0 : vector<1x1x512xf32> to vector<1x512xf32>
    %c0_2 = arith.constant 0 : index
    %c0_3 = arith.constant 0 : index
    %c0_4 = arith.constant 0 : index
    %2 = vector.load %arg2[%c0_2, %c0_3, %c0_4] : memref<1x1x128xf32, #tpu.memory_space<vmem>>, vector<1x1x128xf32>
    %3 = vector.shape_cast %2 : vector<1x1x128xf32> to vector<1x128xf32>
    %4 = tpu.concatenate %1, %3 in 1 : vector<1x512xf32>, vector<1x128xf32> -> vector<1x640xf32>
    %5 = arith.cmpf one, %4, %4 : vector<1x640xf32>
    %cst = arith.constant 0.000000e+00 : f32
    %6 = vector.broadcast %cst : f32 to vector<1x640xf32>
    %7 = arith.select %5, %6, %4 : vector<1x640xi1>, vector<1x640xf32>
    %cst_5 = arith.constant 0.000000e+00 : f32
    %cst_6 = arith.constant 1.000000e+00 : f32
    %8 = vector.broadcast %cst_5 : f32 to vector<1x640xf32>
    %9 = vector.broadcast %cst_6 : f32 to vector<1x640xf32>
    %10 = arith.select %5, %8, %9 : vector<1x640xi1>, vector<1x640xf32>
    %cst_7 = arith.constant 0.000000e+00 : f32
    %11 = vector.broadcast %cst_7 : f32 to vector<1x512xf32>
    %cst_8 = arith.constant 0.000000e+00 : f32
    %12 = vector.broadcast %cst_8 : f32 to vector<1x512xf32>
    %cst_9 = arith.constant 0.000000e+00 : f32
    %13 = vector.broadcast %cst_9 : f32 to vector<1x512xf32>
    %cst_10 = arith.constant 0.000000e+00 : f32
    %14 = vector.broadcast %cst_10 : f32 to vector<1x512xf32>
    %15 = vector.extract_strided_slice %7 {offsets = [0, 0], sizes = [1, 512], strides = [1, 1]} : vector<1x640xf32> to vector<1x512xf32>
    %16 = vector.extract_strided_slice %10 {offsets = [0, 0], sizes = [1, 512], strides = [1, 1]} : vector<1x640xf32> to vector<1x512xf32>
    %17 = arith.addf %11, %15 : vector<1x512xf32>
    %18 = arith.addf %12, %16 : vector<1x512xf32>
    %cst_11 = arith.constant 0.149919525 : f32
    %19 = vector.broadcast %cst_11 : f32 to vector<1x512xf32>
    %20 = arith.mulf %19, %15 : vector<1x512xf32>
    %21 = arith.addf %13, %20 : vector<1x512xf32>
    %cst_12 = arith.constant 1.000000e+00 : f32
    %22 = vector.broadcast %cst_12 : f32 to vector<1x512xf32>
    %23 = arith.subf %22, %16 : vector<1x512xf32>
    %cst_13 = arith.constant 0.149919525 : f32
    %24 = vector.broadcast %cst_13 : f32 to vector<1x512xf32>
    %25 = arith.mulf %24, %23 : vector<1x512xf32>
    %26 = arith.addf %14, %25 : vector<1x512xf32>
    %27 = vector.extract_strided_slice %7 {offsets = [0, 1], sizes = [1, 512], strides = [1, 1]} : vector<1x640xf32> to vector<1x512xf32>
    %28 = vector.extract_strided_slice %10 {offsets = [0, 1], sizes = [1, 512], strides = [1, 1]} : vector<1x640xf32> to vector<1x512xf32>
    %29 = arith.addf %17, %27 : vector<1x512xf32>
    %30 = arith.addf %18, %28 : vector<1x512xf32>
    %cst_14 = arith.constant 0.222887725 : f32
    %31 = vector.broadcast %cst_14 : f32 to vector<1x512xf32>
    %32 = arith.mulf %31, %27 : vector<1x512xf32>
    %33 = arith.addf %21, %32 : vector<1x512xf32>
    %cst_15 = arith.constant 1.000000e+00 : f32
    %34 = vector.broadcast %cst_15 : f32 to vector<1x512xf32>
    %35 = arith.subf %34, %28 : vector<1x512xf32>
    %cst_16 = arith.constant 0.222887725 : f32
    %36 = vector.broadcast %cst_16 : f32 to vector<1x512xf32>
    %37 = arith.mulf %36, %35 : vector<1x512xf32>
    %38 = arith.addf %26, %37 : vector<1x512xf32>
    %39 = vector.extract_strided_slice %7 {offsets = [0, 2], sizes = [1, 512], strides = [1, 1]} : vector<1x640xf32> to vector<1x512xf32>
    %40 = vector.extract_strided_slice %10 {offsets = [0, 2], sizes = [1, 512], strides = [1, 1]} : vector<1x640xf32> to vector<1x512xf32>
    %41 = arith.addf %29, %39 : vector<1x512xf32>
    %42 = arith.addf %30, %40 : vector<1x512xf32>
    %cst_17 = arith.constant 0.25438562 : f32
    %43 = vector.broadcast %cst_17 : f32 to vector<1x512xf32>
    %44 = arith.mulf %43, %39 : vector<1x512xf32>
    %45 = arith.addf %33, %44 : vector<1x512xf32>
    %cst_18 = arith.constant 1.000000e+00 : f32
    %46 = vector.broadcast %cst_18 : f32 to vector<1x512xf32>
    %47 = arith.subf %46, %40 : vector<1x512xf32>
    %cst_19 = arith.constant 0.25438562 : f32
    %48 = vector.broadcast %cst_19 : f32 to vector<1x512xf32>
    %49 = arith.mulf %48, %47 : vector<1x512xf32>
    %50 = arith.addf %38, %49 : vector<1x512xf32>
    %51 = vector.extract_strided_slice %7 {offsets = [0, 3], sizes = [1, 512], strides = [1, 1]} : vector<1x640xf32> to vector<1x512xf32>
    %52 = vector.extract_strided_slice %10 {offsets = [0, 3], sizes = [1, 512], strides = [1, 1]} : vector<1x640xf32> to vector<1x512xf32>
    %53 = arith.addf %41, %51 : vector<1x512xf32>
    %54 = arith.addf %42, %52 : vector<1x512xf32>
    %cst_20 = arith.constant 0.22288768 : f32
    %55 = vector.broadcast %cst_20 : f32 to vector<1x512xf32>
    %56 = arith.mulf %55, %51 : vector<1x512xf32>
    %57 = arith.addf %45, %56 : vector<1x512xf32>
    %cst_21 = arith.constant 1.000000e+00 : f32
    %58 = vector.broadcast %cst_21 : f32 to vector<1x512xf32>
    %59 = arith.subf %58, %52 : vector<1x512xf32>
    %cst_22 = arith.constant 0.22288768 : f32
    %60 = vector.broadcast %cst_22 : f32 to vector<1x512xf32>
    %61 = arith.mulf %60, %59 : vector<1x512xf32>
    %62 = arith.addf %50, %61 : vector<1x512xf32>
    %63 = vector.extract_strided_slice %7 {offsets = [0, 4], sizes = [1, 512], strides = [1, 1]} : vector<1x640xf32> to vector<1x512xf32>
    %64 = vector.extract_strided_slice %10 {offsets = [0, 4], sizes = [1, 512], strides = [1, 1]} : vector<1x640xf32> to vector<1x512xf32>
    %65 = arith.addf %53, %63 : vector<1x512xf32>
    %66 = arith.addf %54, %64 : vector<1x512xf32>
    %cst_23 = arith.constant 0.149919495 : f32
    %67 = vector.broadcast %cst_23 : f32 to vector<1x512xf32>
    %68 = arith.mulf %67, %63 : vector<1x512xf32>
    %69 = arith.addf %57, %68 : vector<1x512xf32>
    %cst_24 = arith.constant 1.000000e+00 : f32
    %70 = vector.broadcast %cst_24 : f32 to vector<1x512xf32>
    %71 = arith.subf %70, %64 : vector<1x512xf32>
    %cst_25 = arith.constant 0.149919495 : f32
    %72 = vector.broadcast %cst_25 : f32 to vector<1x512xf32>
    %73 = arith.mulf %72, %71 : vector<1x512xf32>
    %74 = arith.addf %62, %73 : vector<1x512xf32>
    %75 = arith.divf %65, %66 : vector<1x512xf32>
    %76 = arith.mulf %75, %74 : vector<1x512xf32>
    %77 = arith.addf %69, %76 : vector<1x512xf32>
    %c0_26 = arith.constant 0 : index
    %c0_27 = arith.constant 0 : index
    %c0_28 = arith.constant 0 : index
    %78 = vector.load %arg3[%c0_26, %c0_27, %c0_28] : memref<1x1x512xf32, #tpu.memory_space<vmem>>, vector<1x1x512xf32>
    %79 = vector.shape_cast %78 : vector<1x1x512xf32> to vector<1x512xf32>
    %80 = vector.shape_cast %77 : vector<1x512xf32> to vector<1x1x512xf32>
    tpu.vector_store %arg3[%c0_26, %c0_27, %c0_28], %80 {strides = array<i32>} : memref<1x1x512xf32, #tpu.memory_space<vmem>>, vector<1x1x512xf32>,
    return
  }
  func.func @transform_0(%arg0: i32) -> (i32, i32, i32) {
    %c0_i32 = arith.constant 0 : i32
    %c0_i32_0 = arith.constant 0 : i32
    %c0_i32_1 = arith.constant 0 : i32
    return %arg0, %c0_i32, %c0_i32_0 : i32, i32, i32
  }
  func.func @transform_1(%arg0: i32) -> (i32, i32, i32) {
    %c1_i32 = arith.constant 1 : i32
    %0 = arith.addi %arg0, %c1_i32 : i32
    %c0_i32 = arith.constant 0 : i32
    %c0_i32_0 = arith.constant 0 : i32
    %c0_i32_1 = arith.constant 0 : i32
    return %0, %c0_i32, %c0_i32_0 : i32, i32, i32
  }
  func.func @transform_2(%arg0: i32) -> (i32, i32, i32) {
    %c0_i32 = arith.constant 0 : i32
    %c0_i32_0 = arith.constant 0 : i32
    %c0_i32_1 = arith.constant 0 : i32
    return %arg0, %c0_i32, %c0_i32_0 : i32, i32, i32
  }
}

</mosaic_0001>

<bundles_post_ra>
// kernel: tpu_custom_call.1
= control target key start
LH: loop header
LB: loop body
LE: loop exit
PB: predicated region body
PF: predicated region fallthrough
CT: control target
= control target key end

     0   :  { %7 = vsyncpa [#allocation3], 0  ;;  %s1183_s0 = inlined_call_operand.hbm [shape: f32[2,1,512], index: 0, kind: input, shape index: {}]   ;;  %s1184_s1 = inlined_call_operand.hbm [shape: f32[2,1,512], index: 1, kind: input, shape index: {}]   ;;  %s1185_s2 = inlined_call_operand.hbm [shape: f32[1,1,512], index: 2, kind: output, shape index: {}]  }
   0x1   :  { %8 = vsyncpa [#allocation6], 0 }
   0x2   :  { %9 = vsyncpa [#allocation4], 0  ;;  %s780_s11 = scalar_lea.hbm %s1184_s1, 64  ;;  %s753_s12 = smov [#allocation2]  }
   0x3   :  { %s16_s13 = sshll.u32 %s753_s12, 4  ;;  %s754_s14 = smov [#allocation5]   ;;  %s17_s13 = int_to_ptr.vmem [resolvable:$true] %s16_s13 }
   0x4   :  { %s30_s15 = sshll.u32 %s754_s14, 4  ;;  %s678_s18 = scalar_lea.hbm %s1183_s0, 64  ;;  %s31_s15 = int_to_ptr.vmem [resolvable:$true] %s30_s15 }
   0x5   :  { %p679_p0 = scmp.ne.s32.totalorder %s1183_s0, %s678_s18  ;;  %s680_s23 = scalar_lea.hbm %s1183_s0, 128 }
   0x6   :  { %p681_p1 = scmp.lt.u32.totalorder %s680_s23, %s678_s18  ;;  %p682_p2 = scmp.lt.u32.totalorder %s678_s18, %s1183_s0 }
   0x8   :  { %p683_p3 = por %p682_p2, %p681_p1 }
   0xa   :  { %p684_p4 = pnand %p683_p3, %p679_p0 }
   0xc   :  { %687 = shalt.err (!%p684_p4)
}
   0xd   :  { %s688_s26 = scalar_lea.vmem %s17_s13, 64  ;;  %p693_p6 = scmp.lt.s32.totalorder %s17_s13, %s17_s13 }
   0xe   :  { %p689_p5 = scmp.ne.s32.totalorder %s17_s13, %s688_s26  ;;  %p694_p7 = scmp.lt.s32.totalorder %s688_s26, %s688_s26 }
  0x10   :  { %p695_p8 = por %p694_p7, %p693_p6 }
  0x12   :  { %p696_p9 = pnand %p695_p8, %p689_p5 }
  0x14   :  { %699 = shalt.err (!%p696_p9)
}
  0x15   :  { %19 = dma.hbm_to_vmem [thread:$0]  %s1183_s0, 64, %s17_s13, [#allocation3]  }
  0x16   :  { %s724_s3 = scalar_lea.hbm %s1184_s1, 80  ;;  %s702_s6 = scalar_lea.hbm %s1184_s1, 128 }
  0x17   :  { %p701_p10 = scmp.ne.s32.totalorder %s780_s11, %s724_s3  ;;  %p703_p11 = scmp.lt.u32.totalorder %s780_s11, %s1184_s1 }
  0x18   :  { %p704_p12 = scmp.lt.u32.totalorder %s702_s6, %s724_s3  ;;  %p706_p0 = scmp.lt.u32.totalorder %s724_s3, %s780_s11 }
  0x1a   :  { %p705_p13 = por %p704_p12, %p703_p11 }
  0x1c   :  { %p707_p1 = por %p706_p0, %p705_p13 }
  0x1e   :  { %p708_p2 = pnand %p707_p1, %p701_p10 }
  0x20   :  { %711 = shalt.err (!%p708_p2)
}
  0x21   :  { %s712_s0 = scalar_lea.vmem %s31_s15, 16  ;;  %s716_s9 = scalar_lea.vmem %s31_s15, 32 }
  0x22   :  { %p713_p3 = scmp.ne.s32.totalorder %s31_s15, %s712_s0  ;;  %p717_p4 = scmp.lt.s32.totalorder %s31_s15, %s31_s15 }
  0x23   :  { %p718_p5 = scmp.lt.s32.totalorder %s716_s9, %s712_s0 }
  0x25   :  { %p719_p6 = por %p718_p5, %p717_p4 }
  0x27   :  { %p720_p7 = pnand %p719_p6, %p713_p3 }
  0x29   :  { %723 = shalt.err (!%p720_p7)
}
  0x2a   :  { %33 = dma.hbm_to_vmem [thread:$0]  %s780_s11, 16, %s31_s15, [#allocation6]  }
  0x2b   :  { %747 = dma.done.wait [#allocation3], 64  }
  0x2c   :  { %748 = vsyncadd [#allocation3], 4294967232 }
  0x2d   :  { %749 = dma.done.wait [#allocation6], 16  }
  0x2e   :  { %750 = vsyncadd [#allocation6], 4294967280  ;;  %v44_v0 = vlaneseq  ;;  %v41_v6 = vld [vmem:[#allocation2] sm:$0xf]  ;;  %v42_v7 = vld [vmem:[#allocation5] sm:$0x1] }
  0x2f   :  { %vm68_vm0 = vcmp.ne.f32.partialorder %v42_v7, %v42_v7  ;;  %v755_v11 = vmov 1.0   ;;  %s756_s1 = smov 127   ;;  %s757_s10 = smov 126   ;;  %vm122_vm5 = vcmask 1039360   ;;  %vm237_vm6 = vcmask 1031168  }
  0x30   :  { %v811_v1 = vshrl.u32 %v44_v0, 7  ;;  %v817_v12 = vsel %vm68_vm0, 0.0, %v755_v11  ;;  %v819_v13 = vsel %vm68_vm0, 0.0, %v42_v7  ;;  %s758_s11 = smov 125   ;;  %s759_s12 = smov 124   ;;  %vm346_vm7 = vcmask 1022976  }
  0x31   :  { %148 = vrot.lane.b32.xlu1 %v817_v12, %s756_s1  ;;  %120 = vrot.lane.b32.xlu0 %v819_v13, %s756_s1  ;;  %v166_v31 = vmul.f32 0.22288772, %v819_v13  ;;  %v879_v36 = vsub.f32 1.0, %v817_v12  ;;  %v276_v45 = vmul.f32 0.25438562, %v819_v13  ;;  %vm455_vm8 = vcmask 1014784  }
  0x32   :  { %v54_v2 = vsub.s32 2, %v811_v1  ;;  %v46_v3 = vsub.s32 0, %v811_v1  ;;  %v58_v4 = vsub.s32 3, %v811_v1  ;;  %v50_v5 = vsub.s32 1, %v811_v1  ;;  %s761_s13 = smov [#allocation7]  }
  0x33   :  { %v199_v38 = vmul.f32 0.22288772, %v879_v36  ;;  %v308_v48 = vmul.f32 0.25438562, %v879_v36  ;;  %v417_v53 = vmul.f32 0.22288768, %v879_v36 }
  0x34   :  { %v55_v8 = vrot.slane %v41_v6, %v54_v2  ;;  %v47_v9 = vrot.slane %v41_v6, %v46_v3  ;;  %v59_v10 = vrot.slane %v41_v6, %v58_v4  ;;  %v51_v14 = vrot.slane %v41_v6, %v50_v5  ;;  %s610_s14 = sshll.u32 %s761_s13, 4  ;;  %s611_s14 = int_to_ptr.vmem [resolvable:$true] %s610_s14 }
  0x35   :  { %v385_v60 = vmul.f32 0.22288768, %v819_v13  ;;  %vm601_vm9 = vcmp.lt.s32.totalorder %v44_v0, 512  ;;  %s725_s15 = scalar_lea.vmem %s611_s14, 64  ;;  %p730_p9 = scmp.lt.s32.totalorder %s611_s14, %s611_s14 }
  0x36   :  { %vm66_vm1 = vcmp.ne.f32.partialorder %v55_v8, %v55_v8  ;;  %vm64_vm2 = vcmp.ne.f32.partialorder %v47_v9, %v47_v9  ;;  %vm67_vm3 = vcmp.ne.f32.partialorder %v59_v10, %v59_v10  ;;  %vm65_vm4 = vcmp.ne.f32.partialorder %v51_v14, %v51_v14  ;;  %p726_p8 = scmp.ne.s32.totalorder %s611_s14, %s725_s15  ;;  %p731_p10 = scmp.lt.s32.totalorder %s725_s15, %s725_s15 }
  0x37   :  { %v825_v15 = vsel %vm66_vm1, 0.0, %v55_v8  ;;  %v827_v16 = vsel %vm64_vm2, 0.0, %v47_v9  ;;  %v833_v17 = vsel %vm67_vm3, 0.0, %v59_v10  ;;  %v835_v18 = vsel %vm65_vm4, 0.0, %v51_v14 }
  0x38   :  { %116 = vrot.lane.b32.xlu1 %v825_v15, %s756_s1  ;;  %112 = vrot.lane.b32.xlu0 %v827_v16, %s756_s1  ;;  %v837_v19 = vsel %vm64_vm2, 0.0, %v755_v11  ;;  %v839_v20 = vsel %vm65_vm4, 0.0, %v755_v11  ;;  %v841_v21 = vsel %vm66_vm1, 0.0, %v755_v11  ;;  %v843_v22 = vsel %vm67_vm3, 0.0, %v755_v11  ;;  %p732_p11 = por %p731_p10, %p730_p9 }
  0x39   :  { %v630_v23 = vpack.i.bf16 %v839_v20, %v837_v19  ;;  %v635_v24 = vpack.i.bf16 %v843_v22, %v841_v21  ;;  %v163_v25 = vmul.f32 0.22288772, %v835_v18  ;;  %v162_v26 = vmul.f32 0.22288772, %v827_v16 }
  0x3a   :  { %v165_v27 = vmul.f32 0.22288772, %v833_v17  ;;  %v164_v28 = vmul.f32 0.22288772, %v825_v15  ;;  %v862_v29 = vsub.f32 1.0, %v837_v19  ;;  %v869_v32 = vsub.f32 1.0, %v841_v21  ;;  %p733_p12 = pnand %p732_p11, %p726_p8 }
  0x3b   :  { %v872_v33 = vsub.f32 1.0, %v839_v20  ;;  %v882_v37 = vsub.f32 1.0, %v843_v22  ;;  %v273_v40 = vmul.f32 0.25438562, %v835_v18  ;;  %v272_v41 = vmul.f32 0.25438562, %v827_v16 }
  0x3c   :  { %118 = vrot.lane.b32.xlu1 %v833_v17, %s756_s1  ;;  %114 = vrot.lane.b32.xlu0 %v835_v18, %s756_s1  ;;  %v195_v30 = vmul.f32 0.22288772, %v862_v29  ;;  %v197_v34 = vmul.f32 0.22288772, %v869_v32  ;;  %v275_v42 = vmul.f32 0.25438562, %v833_v17 }
  0x3d   :  { %v196_v35 = vmul.f32 0.22288772, %v872_v33  ;;  %v198_v39 = vmul.f32 0.22288772, %v882_v37  ;;  %v274_v43 = vmul.f32 0.25438562, %v825_v15 }
  0x3e   :  { %v304_v44 = vmul.f32 0.25438562, %v862_v29  ;;  %v306_v46 = vmul.f32 0.25438562, %v869_v32  ;;  %v305_v47 = vmul.f32 0.25438562, %v872_v33 }
  0x3f   :  { %v307_v49 = vmul.f32 0.25438562, %v882_v37  ;;  %v413_v50 = vmul.f32 0.22288768, %v862_v29  ;;  %v415_v51 = vmul.f32 0.22288768, %v869_v32 }
  0x40   :  { %631 = vrot.lane.b32.xlu1 %v630_v23, %s756_s1  ;;  %636 = vrot.lane.b32.xlu0 %v635_v24, %s756_s1  ;;  %v414_v52 = vmul.f32 0.22288768, %v872_v33  ;;  %v416_v54 = vmul.f32 0.22288768, %v882_v37  ;;  %v381_v55 = vmul.f32 0.22288768, %v827_v16 }
  0x41   :  { %v383_v56 = vmul.f32 0.22288768, %v825_v15  ;;  %v382_v57 = vmul.f32 0.22288768, %v835_v18  ;;  %v384_v61 = vmul.f32 0.22288768, %v833_v17 }
  0x42   :  { %v523_v2 = vmul.f32 0.1499195, %v872_v33  ;;  %v522_v3 = vmul.f32 0.1499195, %v862_v29  ;;  %v525_v10 = vmul.f32 0.1499195, %v882_v37 }
  0x43   :  { %v524_v11 = vmul.f32 0.1499195, %v869_v32 }
  0x44   :  { %174 = vrot.lane.b32.xlu1 %v163_v25, %s756_s1  ;;  %172 = vrot.lane.b32.xlu0 %v162_v26, %s756_s1  ;;  %v490_v26 = vmul.f32 0.1499195, %v827_v16 }
  0x48   :  { %178 = vrot.lane.b32.xlu1 %v165_v27, %s756_s1  ;;  %176 = vrot.lane.b32.xlu0 %v164_v28, %s756_s1 }
  0x4c   :  { %205 = vrot.lane.b32.xlu1 %v195_v30, %s756_s1  ;;  %180 = vrot.lane.b32.xlu0 %v166_v31, %s756_s1  ;;  %v526_v30 = vmul.f32 0.1499195, %v879_v36 }
  0x50   :  { %209 = vrot.lane.b32.xlu1 %v197_v34, %s756_s1  ;;  %207 = vrot.lane.b32.xlu0 %v196_v35, %s756_s1 }
  0x54   :  { %213 = vrot.lane.b32.xlu1 %v199_v38, %s756_s1  ;;  %211 = vrot.lane.b32.xlu0 %v198_v39, %s756_s1  ;;  %v492_v38 = vmul.f32 0.1499195, %v825_v15  ;;  %v491_v39 = vmul.f32 0.1499195, %v835_v18 }
  0x58   :  { %229 = vrot.lane.b32.xlu1 %v835_v18, %s757_s10  ;;  %227 = vrot.lane.b32.xlu0 %v827_v16, %s757_s10 }
  0x5c   :  { %233 = vrot.lane.b32.xlu1 %v833_v17, %s757_s10  ;;  %231 = vrot.lane.b32.xlu0 %v825_v15, %s757_s10 }
  0x60   :  { %641 = vrot.lane.b32.xlu1 %v630_v23, %s757_s10  ;;  %235 = vrot.lane.b32.xlu0 %v819_v13, %s757_s10 }
  0x64   :  { %258 = vrot.lane.b32.xlu1 %v817_v12, %s757_s10  ;;  %646 = vrot.lane.b32.xlu0 %v635_v24, %s757_s10 }
  0x68   :  { %284 = vrot.lane.b32.xlu1 %v273_v40, %s757_s10  ;;  %282 = vrot.lane.b32.xlu0 %v272_v41, %s757_s10 }
  0x6c   :  { %288 = vrot.lane.b32.xlu1 %v275_v42, %s757_s10  ;;  %286 = vrot.lane.b32.xlu0 %v274_v43, %s757_s10  ;;  %v494_v43 = vmul.f32 0.1499195, %v819_v13 }
  0x70   :  { %314 = vrot.lane.b32.xlu1 %v304_v44, %s757_s10  ;;  %290 = vrot.lane.b32.xlu0 %v276_v45, %s757_s10  ;;  %v493_v44 = vmul.f32 0.1499195, %v833_v17 }
  0x74   :  { %656 = vrot.lane.b32.xlu1 %v635_v24, %s758_s11  ;;  %651 = vrot.lane.b32.xlu0 %v630_v23, %s758_s11 }
  0x78   :  { %661 = vrot.lane.b32.xlu1 %v630_v23, %s759_s12  ;;  %367 = vrot.lane.b32.xlu0 %v817_v12, %s758_s11 }
  0x7c   :  { %476 = vrot.lane.b32.xlu1 %v817_v12, %s759_s12  ;;  %666 = vrot.lane.b32.xlu0 %v635_v24, %s759_s12 }
  0x80   :  { %318 = vrot.lane.b32.xlu1 %v306_v46, %s757_s10  ;;  %316 = vrot.lane.b32.xlu0 %v305_v47, %s757_s10 }
  0x84   :  { %322 = vrot.lane.b32.xlu1 %v308_v48, %s757_s10  ;;  %320 = vrot.lane.b32.xlu0 %v307_v49, %s757_s10  ;;  %v99_v48 = vmul.f32 0.14991952, %v862_v29  ;;  %v100_v49 = vmul.f32 0.14991952, %v872_v33 }
  0x88   :  { %338 = vrot.lane.b32.xlu1 %v835_v18, %s758_s11  ;;  %336 = vrot.lane.b32.xlu0 %v827_v16, %s758_s11 }
  0x8c   :  { %342 = vrot.lane.b32.xlu1 %v833_v17, %s758_s11  ;;  %340 = vrot.lane.b32.xlu0 %v825_v15, %s758_s11 }
  0x90   :  { %423 = vrot.lane.b32.xlu1 %v413_v50, %s758_s11  ;;  %344 = vrot.lane.b32.xlu0 %v819_v13, %s758_s11 }
  0x94   :  { %427 = vrot.lane.b32.xlu1 %v415_v51, %s758_s11  ;;  %425 = vrot.lane.b32.xlu0 %v414_v52, %s758_s11 }
  0x98   :  { %431 = vrot.lane.b32.xlu1 %v417_v53, %s758_s11  ;;  %429 = vrot.lane.b32.xlu0 %v416_v54, %s758_s11 }
  0x9c   :  { %447 = vrot.lane.b32.xlu1 %v835_v18, %s759_s12  ;;  %445 = vrot.lane.b32.xlu0 %v827_v16, %s759_s12 }
  0xa0   :  { %451 = vrot.lane.b32.xlu1 %v833_v17, %s759_s12  ;;  %449 = vrot.lane.b32.xlu0 %v825_v15, %s759_s12 }
  0xa3   :  { %v149_v58 = vpop.permute.xlu1 %148  ;;  %v121_v59 = vpop.permute.xlu0 %120 }
  0xa4   :  { %391 = vrot.lane.b32.xlu1 %v381_v55, %s758_s11  ;;  %453 = vrot.lane.b32.xlu0 %v819_v13, %s759_s12  ;;  %v101_v55 = vmul.f32 0.14991952, %v869_v32 }
  0xa8   :  { %395 = vrot.lane.b32.xlu1 %v383_v56, %s758_s11  ;;  %393 = vrot.lane.b32.xlu0 %v382_v57, %s758_s11  ;;  %v102_v56 = vmul.f32 0.14991952, %v882_v37 }
  0xaa   :  { %v117_v62 = vpop.permute.xlu1 %116  ;;  %v113_v63 = vpop.permute.xlu0 %112 }
  0xac   :  { %399 = vrot.lane.b32.xlu1 %v385_v60, %s758_s11  ;;  %397 = vrot.lane.b32.xlu0 %v384_v61, %s758_s11 }
  0xae   :  { %v119_v4 = vpop.permute.xlu1 %118  ;;  %v115_v5 = vpop.permute.xlu0 %114 }
  0xaf   :  { %v125_v6 = vsel %vm122_vm5, %v117_v62, %v119_v4  ;;  %v976_v7 = vsel %vm122_vm5, %v119_v4, %v121_v59  ;;  %v123_v8 = vsel %vm122_vm5, %v113_v63, %v115_v5  ;;  %v124_v9 = vsel %vm122_vm5, %v115_v5, %v117_v62 }
  0xb0   :  { %534 = vrot.lane.b32.xlu1 %v523_v2, %s759_s12  ;;  %532 = vrot.lane.b32.xlu0 %v522_v3, %s759_s12  ;;  %v131_v61 = vadd.f32 %v123_v8, %v827_v16  ;;  %v133_v3 = vadd.f32 %v125_v6, %v825_v15  ;;  %v132_v4 = vadd.f32 %v124_v9, %v835_v18 }
  0xb2   :  { %v984_v12 = vpop.permute.xlu1 %631  ;;  %v986_v14 = vpop.permute.xlu0 %636 }
  0xb3   :  { %v634_v23 = vunpack.i.h.bf16 %v984_v12  ;;  %v639_v24 = vunpack.i.h.bf16 %v986_v14  ;;  %v638_v25 = vunpack.i.l.bf16 %v986_v14  ;;  %v633_v37 = vunpack.i.l.bf16 %v984_v12 }
  0xb4   :  { %538 = vrot.lane.b32.xlu1 %v525_v10, %s759_s12  ;;  %536 = vrot.lane.b32.xlu0 %v524_v11, %s759_s12 }
  0xb5   :  { %v996_v27 = vsel %vm122_vm5, %v639_v24, %v149_v58  ;;  %v1001_v28 = vsel %vm122_vm5, %v634_v23, %v638_v25 }
  0xb6   :  { %v175_v31 = vpop.permute.xlu1 %174  ;;  %v173_v34 = vpop.permute.xlu0 %172  ;;  %v161_v14 = vadd.f32 %v996_v27, %v843_v22  ;;  %v90_v27 = vmul.f32 0.14991952, %v833_v17 }
  0xb7   :  { %v1006_v35 = vsel %vm122_vm5, %v173_v34, %v175_v31  ;;  %v134_v34 = vadd.f32 %v976_v7, %v833_v17  ;;  %v87_v7 = vmul.f32 0.14991952, %v827_v16 }
  0xb8   :  { %500 = vrot.lane.b32.xlu1 %v490_v26, %s759_s12  ;;  %540 = vrot.lane.b32.xlu0 %v526_v30, %s759_s12 }
  0xba   :  { %v179_v40 = vpop.permute.xlu1 %178  ;;  %v177_v41 = vpop.permute.xlu0 %176 }
  0xbb   :  { %v1013_v42 = vsel %vm122_vm5, %v175_v31, %v177_v41  ;;  %v1016_v36 = vsel %vm122_vm5, %v177_v41, %v179_v40  ;;  %v150_v31 = vsel %vm122_vm5, %v633_v37, %v634_v23 }
  0xbc   :  { %504 = vrot.lane.b32.xlu1 %v492_v38, %s759_s12  ;;  %502 = vrot.lane.b32.xlu0 %v491_v39, %s759_s12 }
  0xbe   :  { %v206_v45 = vpop.permute.xlu1 %205  ;;  %v181_v46 = vpop.permute.xlu0 %180 }
  0xbf   :  { %v1023_v47 = vsel %vm122_vm5, %v179_v40, %v181_v46  ;;  %v158_v40 = vadd.f32 %v150_v31, %v837_v19  ;;  %v159_v19 = vadd.f32 %v1001_v28, %v839_v20 }
  0xc0   :  { %508 = vrot.lane.b32.xlu1 %v494_v43, %s759_s12  ;;  %506 = vrot.lane.b32.xlu0 %v493_v44, %s759_s12  ;;  %v152_v43 = vsel %vm122_vm5, %v638_v25, %v639_v24  ;;  %v89_v24 = vmul.f32 0.14991952, %v825_v15 }
  0xc2   :  { %v210_v50 = vpop.permute.xlu1 %209  ;;  %v208_v51 = vpop.permute.xlu0 %207  ;;  %v192_v22 = vadd.f32 %v1016_v36, %v89_v24 }
  0xc3   :  { %v215_v13 = vsel %vm122_vm5, %v206_v45, %v208_v51  ;;  %v216_v52 = vsel %vm122_vm5, %v208_v51, %v210_v50  ;;  %v88_v51 = vmul.f32 0.14991952, %v835_v18 }
  0xc4   :  { %v1031_v53 = vadd.f32 %v215_v13, %v99_v48  ;;  %v1033_v54 = vadd.f32 %v216_v52, %v100_v49  ;;  %v190_v52 = vadd.f32 %v1006_v35, %v87_v7 }
  0xc5   :  { %v191_v15 = vadd.f32 %v1013_v42, %v88_v51 }
  0xc6   :  { %v214_v57 = vpop.permute.xlu1 %213  ;;  %v212_v29 = vpop.permute.xlu0 %211 }
  0xc7   :  { %v217_v33 = vsel %vm122_vm5, %v210_v50, %v212_v29  ;;  %v218_v58 = vsel %vm122_vm5, %v212_v29, %v214_v57  ;;  %v160_v50 = vadd.f32 %v152_v43, %v841_v21 }
  0xc8   :  { %v1039_v59 = vadd.f32 %v217_v33, %v101_v55  ;;  %v1041_v60 = vadd.f32 %v218_v58, %v102_v56 }
  0xca   :  { %v230_v62 = vpop.permute.xlu1 %229  ;;  %v228_v63 = vpop.permute.xlu0 %227 }
  0xcb   :  { %v238_v2 = vsel %vm237_vm6, %v228_v63, %v230_v62  ;;  %v193_v63 = vadd.f32 %v1023_v47, %v90_v27 }
  0xcc   :  { %v1045_v32 = vadd.f32 %v238_v2, %v131_v61 }
  0xce   :  { %v234_v5 = vpop.permute.xlu1 %233  ;;  %v232_v10 = vpop.permute.xlu0 %231 }
  0xcf   :  { %v239_v11 = vsel %vm237_vm6, %v230_v62, %v232_v10  ;;  %v240_v26 = vsel %vm237_vm6, %v232_v10, %v234_v5 }
  0xd0   :  { %v1052_v30 = vadd.f32 %v239_v11, %v132_v4  ;;  %v1054_v8 = vadd.f32 %v240_v26, %v133_v3 }
  0xd2   :  { %v642_v12 = vpop.permute.xlu1 %641  ;;  %v236_v38 = vpop.permute.xlu0 %235 }
  0xd3   :  { %v644_v6 = vunpack.i.h.bf16 %v642_v12  ;;  %v643_v39 = vunpack.i.l.bf16 %v642_v12  ;;  %v241_v9 = vsel %vm237_vm6, %v234_v5, %v236_v38 }
  0xd4   :  { %v1061_v41 = vadd.f32 %v241_v9, %v134_v34 }
  0xd5   :  { %v260_v23 = vsel %vm237_vm6, %v643_v39, %v644_v6 }
  0xd6   :  { %v1070_v44 = vadd.f32 %v260_v23, %v158_v40  ;;  %v259_v45 = vpop.permute.xlu1 %258  ;;  %v647_v46 = vpop.permute.xlu0 %646 }
  0xd7   :  { %v649_v48 = vunpack.i.h.bf16 %v647_v46  ;;  %v648_v49 = vunpack.i.l.bf16 %v647_v46 }
  0xd9   :  { %v261_v16 = vsel %vm237_vm6, %v644_v6, %v648_v49  ;;  %v262_v25 = vsel %vm237_vm6, %v648_v49, %v649_v48  ;;  %v263_v13 = vsel %vm237_vm6, %v649_v48, %v259_v45 }
  0xda   :  { %v269_v55 = vadd.f32 %v261_v16, %v159_v19  ;;  %v270_v56 = vadd.f32 %v262_v25, %v160_v50  ;;  %v285_v20 = vpop.permute.xlu1 %284  ;;  %v283_v28 = vpop.permute.xlu0 %282  ;;  %v1083_v21 = vadd.f32 %v263_v13, %v161_v14 }
  0xdb   :  { %v292_v18 = vsel %vm237_vm6, %v283_v28, %v285_v20 }
  0xdc   :  { %v1086_v57 = vadd.f32 %v292_v18, %v190_v52 }
  0xde   :  { %v289_v29 = vpop.permute.xlu1 %288  ;;  %v287_v33 = vpop.permute.xlu0 %286 }
  0xdf   :  { %v293_v35 = vsel %vm237_vm6, %v285_v20, %v287_v33  ;;  %v294_v58 = vsel %vm237_vm6, %v287_v33, %v289_v29 }
  0xe0   :  { %v1093_v61 = vadd.f32 %v293_v35, %v191_v15  ;;  %v1095_v62 = vadd.f32 %v294_v58, %v192_v22 }
  0xe2   :  { %v315_v2 = vpop.permute.xlu1 %314  ;;  %v291_v37 = vpop.permute.xlu0 %290 }
  0xe3   :  { %v295_v42 = vsel %vm237_vm6, %v289_v29, %v291_v37 }
  0xe4   :  { %v1099_v3 = vadd.f32 %v295_v42, %v193_v63 }
  0xe6   :  { %v657_v36 = vpop.permute.xlu1 %656  ;;  %v652_v17 = vpop.permute.xlu0 %651 }
  0xe7   :  { %v654_v6 = vunpack.i.h.bf16 %v652_v17  ;;  %v653_v39 = vunpack.i.l.bf16 %v652_v17  ;;  %v658_v7 = vunpack.i.l.bf16 %v657_v36  ;;  %v659_v45 = vunpack.i.h.bf16 %v657_v36 }
  0xe9   :  { %v369_v46 = vsel %vm346_vm7, %v653_v39, %v654_v6  ;;  %v370_v51 = vsel %vm346_vm7, %v654_v6, %v658_v7  ;;  %v371_v24 = vsel %vm346_vm7, %v658_v7, %v659_v45 }
  0xea   :  { %v662_v4 = vpop.permute.xlu1 %661  ;;  %v368_v5 = vpop.permute.xlu0 %367  ;;  %v377_v14 = vadd.f32 %v369_v46, %v1070_v44  ;;  %v378_v20 = vadd.f32 %v370_v51, %v269_v55  ;;  %v379_v18 = vadd.f32 %v371_v24, %v270_v56 }
  0xeb   :  { %v664_v43 = vunpack.i.h.bf16 %v662_v4  ;;  %v663_v23 = vunpack.i.l.bf16 %v662_v4  ;;  %v372_v15 = vsel %vm346_vm7, %v659_v45, %v368_v5 }
  0xec   :  { %v380_v35 = vadd.f32 %v372_v15, %v1083_v21 }
  0xed   :  { %v478_v19 = vsel %vm455_vm8, %v663_v23, %v664_v43 }
  0xee   :  { %v477_v10 = vpop.permute.xlu1 %476  ;;  %v667_v11 = vpop.permute.xlu0 %666  ;;  %v486_v13 = vadd.f32 %v478_v19, %v377_v14 }
  0xef   :  { %v669_v50 = vunpack.i.h.bf16 %v667_v11 }
  0xf0   :  { %670 = vrcp.f32 %v486_v13 }
  0xf1   :  { %v481_v44 = vsel %vm455_vm8, %v669_v50, %v477_v10 }
  0xf2   :  { %v1101_v26 = vpop.permute.xlu1 %318  ;;  %v1103_v31 = vpop.permute.xlu0 %316 }
  0xf3   :  { %v324_v34 = vsel %vm237_vm6, %v315_v2, %v1103_v31  ;;  %v489_v2 = vadd.f32 %v481_v44, %v380_v35 }
  0xf4   :  { %v1108_v47 = vadd.f32 %v324_v34, %v1031_v53  ;;  %v668_v53 = vunpack.i.l.bf16 %v667_v11 }
  0xf6   :  { %v1110_v12 = vpop.permute.xlu1 %322  ;;  %v1112_v38 = vpop.permute.xlu0 %320  ;;  %v479_v52 = vsel %vm455_vm8, %v664_v43, %v668_v53  ;;  %v480_v28 = vsel %vm455_vm8, %v668_v53, %v669_v50 }
  0xf7   :  { %v487_v22 = vadd.f32 %v479_v52, %v378_v20  ;;  %v488_v33 = vadd.f32 %v480_v28, %v379_v18  ;;  %v325_v20 = vsel %vm237_vm6, %v1103_v31, %v1101_v26  ;;  %v327_v31 = vsel %vm237_vm6, %v1112_v38, %v1110_v12 }
  0xf9   :  { %672 = vrcp.f32 %v487_v22 }
  0xfa   :  { %v339_v9 = vpop.permute.xlu1 %338  ;;  %v337_v40 = vpop.permute.xlu0 %336  ;;  %674 = vrcp.f32 %v488_v33 }
  0xfb   :  { %v347_v55 = vsel %vm346_vm7, %v337_v40, %v339_v9  ;;  %676 = vrcp.f32 %v489_v2  ;;  %v671_v21 = vpop.eup %670 }
  0xfc   :  { %v355_v56 = vadd.f32 %v347_v55, %v1045_v32 }
  0xfe   :  { %v343_v48 = vpop.permute.xlu1 %342  ;;  %v341_v49 = vpop.permute.xlu0 %340 }
  0xff   :  { %v348_v36 = vsel %vm346_vm7, %v339_v9, %v341_v49  ;;  %v349_v17 = vsel %vm346_vm7, %v341_v49, %v343_v48 }
 0x100   :  { %v356_v10 = vadd.f32 %v348_v36, %v1052_v30  ;;  %v357_v11 = vadd.f32 %v349_v17, %v1054_v8 }
 0x102   :  { %v424_v16 = vpop.permute.xlu1 %423  ;;  %v345_v25 = vpop.permute.xlu0 %344 }
 0x103   :  { %v350_v32 = vsel %vm346_vm7, %v343_v48, %v345_v25  ;;  %v673_v9 = vpop.eup %672 }
 0x104   :  { %v675_v45 = vpop.eup %674  ;;  %v358_v46 = vadd.f32 %v350_v32, %v1061_v41  ;;  %v326_v41 = vsel %vm237_vm6, %v1101_v26, %v1112_v38 }
 0x105   :  { %v677_v51 = vpop.eup %676  ;;  %v334_v35 = vadd.f32 %v326_v41, %v1039_v59 }
 0x106   :  { %v428_v27 = vpop.permute.xlu1 %427  ;;  %v426_v29 = vpop.permute.xlu0 %425 }
 0x107   :  { %v433_v52 = vsel %vm346_vm7, %v424_v16, %v426_v29  ;;  %v434_v22 = vsel %vm346_vm7, %v426_v29, %v428_v27  ;;  %v333_v16 = vadd.f32 %v325_v20, %v1033_v54  ;;  %v335_v54 = vadd.f32 %v327_v31, %v1041_v60 }
 0x108   :  { %v441_v18 = vadd.f32 %v433_v52, %v1108_v47 }
 0x109   :  { %v442_v55 = vadd.f32 %v434_v22, %v333_v16 }
 0x10a   :  { %v432_v58 = vpop.permute.xlu1 %431  ;;  %v430_v63 = vpop.permute.xlu0 %429 }
 0x10b   :  { %v435_v33 = vsel %vm346_vm7, %v428_v27, %v430_v63  ;;  %v436_v29 = vsel %vm346_vm7, %v430_v63, %v432_v58 }
 0x10e   :  { %v448_v37 = vpop.permute.xlu1 %447  ;;  %v446_v42 = vpop.permute.xlu0 %445 }
 0x10f   :  { %v456_v4 = vsel %vm455_vm8, %v446_v42, %v448_v37 }
 0x110   :  { %v464_v5 = vadd.f32 %v456_v4, %v355_v56  ;;  %v443_v56 = vadd.f32 %v435_v33, %v334_v35  ;;  %v444_v4 = vadd.f32 %v436_v29, %v335_v54 }
 0x112   :  { %v555_v34 = vmul.f32 %v671_v21, %v464_v5  ;;  %v452_v6 = vpop.permute.xlu1 %451  ;;  %v450_v39 = vpop.permute.xlu0 %449 }
 0x113   :  { %v457_v40 = vsel %vm455_vm8, %v448_v37, %v450_v39  ;;  %v458_v43 = vsel %vm455_vm8, %v450_v39, %v452_v6 }
 0x114   :  { %v465_v23 = vadd.f32 %v457_v40, %v356_v10  ;;  %v466_v7 = vadd.f32 %v458_v43, %v357_v11 }
 0x116   :  { %v557_v49 = vmul.f32 %v673_v9, %v465_v23  ;;  %v559_v53 = vmul.f32 %v675_v45, %v466_v7  ;;  %v392_v30 = vpop.permute.xlu1 %391  ;;  %v454_v19 = vpop.permute.xlu0 %453 }
 0x117   :  { %v459_v8 = vsel %vm455_vm8, %v452_v6, %v454_v19 }
 0x118   :  { %v467_v50 = vadd.f32 %v459_v8, %v358_v46 }
 0x11a   :  { %v561_v14 = vmul.f32 %v677_v51, %v467_v50  ;;  %v396_v48 = vpop.permute.xlu1 %395  ;;  %v394_v24 = vpop.permute.xlu0 %393 }
 0x11b   :  { %v401_v38 = vsel %vm346_vm7, %v392_v30, %v394_v24  ;;  %v402_v10 = vsel %vm346_vm7, %v394_v24, %v396_v48 }
 0x11c   :  { %v409_v39 = vadd.f32 %v401_v38, %v1086_v57  ;;  %v410_v60 = vadd.f32 %v402_v10, %v1093_v61 }
 0x11e   :  { %v400_v25 = vpop.permute.xlu1 %399  ;;  %v398_v13 = vpop.permute.xlu0 %397 }
 0x11f   :  { %v403_v43 = vsel %vm346_vm7, %v396_v48, %v398_v13  ;;  %v404_v9 = vsel %vm346_vm7, %v398_v13, %v400_v25 }
 0x120   :  { %v411_v30 = vadd.f32 %v403_v43, %v1095_v62  ;;  %v412_v57 = vadd.f32 %v404_v9, %v1099_v3 }
 0x122   :  { %v535_v28 = vpop.permute.xlu1 %534  ;;  %v533_v15 = vpop.permute.xlu0 %532 }
 0x123   :  { %v542_v44 = vsel %vm455_vm8, %v533_v15, %v535_v28 }
 0x124   :  { %v550_v2 = vadd.f32 %v542_v44, %v441_v18 }
 0x126   :  { %v539_v26 = vpop.permute.xlu1 %538  ;;  %v562_v47 = vmul.f32 %v555_v34, %v550_v2  ;;  %v537_v37 = vpop.permute.xlu0 %536  ;;  %v760_v34 = vmov 1966171168  }
 0x127   :  { %v543_v27 = vsel %vm455_vm8, %v535_v28, %v537_v37  ;;  %v544_v42 = vsel %vm455_vm8, %v537_v37, %v539_v26  ;;  %v577_v6 = vunpack.c.l.s4 %v760_v34 }
 0x128   :  { %v551_v36 = vadd.f32 %v543_v27, %v442_v55  ;;  %v552_v59 = vadd.f32 %v544_v42, %v443_v56 }
 0x12a   :  { %v501_v17 = vpop.permute.xlu1 %500  ;;  %v563_v5 = vmul.f32 %v557_v49, %v551_v36  ;;  %v564_v21 = vmul.f32 %v559_v53, %v552_v59  ;;  %v541_v12 = vpop.permute.xlu0 %540  ;;  %v578_v49 = vunpack.c.0.s8 %v577_v6 }
 0x12b   :  { %v545_v11 = vsel %vm455_vm8, %v539_v26, %v541_v12 }
 0x12c   :  { %v553_v58 = vadd.f32 %v545_v11, %v444_v4  ;;  %v581_v25 = vsub.s32 %v578_v49, %v811_v1 }
 0x12e   :  { %v505_v63 = vpop.permute.xlu1 %504  ;;  %v565_v32 = vmul.f32 %v561_v14, %v553_v58  ;;  %v503_v40 = vpop.permute.xlu0 %502 }
 0x12f   :  { %v510_v23 = vsel %vm455_vm8, %v501_v17, %v503_v40  ;;  %v511_v7 = vsel %vm455_vm8, %v503_v40, %v505_v63 }
 0x130   :  { %v518_v45 = vadd.f32 %v510_v23, %v409_v39  ;;  %v519_v46 = vadd.f32 %v511_v7, %v410_v60 }
 0x132   :  { %v509_v53 = vpop.permute.xlu1 %508  ;;  %v566_v19 = vadd.f32 %v562_v47, %v518_v45  ;;  %v567_v61 = vadd.f32 %v563_v5, %v519_v46  ;;  %v507_v8 = vpop.permute.xlu0 %506 }
 0x133   :  { %v512_v50 = vsel %vm455_vm8, %v505_v63, %v507_v8  ;;  %v513_v51 = vsel %vm455_vm8, %v507_v8, %v509_v53 }
 0x134   :  { %v574_v14 = vcombine.low %v566_v19, %v567_v61  ;;  %v520_v48 = vadd.f32 %v512_v50, %v411_v30  ;;  %v521_v24 = vadd.f32 %v513_v51, %v412_v57 }
 0x136   :  { %v568_v13 = vadd.f32 %v564_v21, %v520_v48  ;;  %v569_v52 = vadd.f32 %v565_v32, %v521_v24  ;;  %v582_v41 = vrot.slane %v574_v14, %v581_v25 }
 0x138   :  { %v575_v20 = vcombine.low %v568_v13, %v569_v52 }
 0x13a   :  { %v589_v28 = vrot.slane %v575_v20, %v581_v25 }
 0x13c   :  { %v590_v62 = vcombine.low %v582_v41, %v589_v28 }
 0x13e   :  { %v597_v3 = vrot.slane %v590_v62, %v581_v25 }
 0x140   :  { %603 = vst.msk [vmem:[#allocation7] sm:$0xf] %vm601_vm9, %v597_v3 }
 0x141   :  { %736 = shalt.err (!%p733_p12)
}
 0x142   :  { %s737_s18 = scalar_lea.hbm %s1185_s2, 64 }
 0x143   :  { %p738_p13 = scmp.ne.s32.totalorder %s1185_s2, %s737_s18  ;;  %p741_p0 = scmp.lt.u32.totalorder %s737_s18, %s1185_s2 }
 0x145   :  { %p743_p1 = pnand %p741_p0, %p738_p13 }
 0x147   :  { %746 = shalt.err (!%p743_p1)
}
 0x148   :  { %613 = dma.vmem_to_hbm [thread:$0]  %s611_s14, 64, %s1185_s2, [#allocation4]  }
 0x149   :  { %751 = dma.done.wait [#allocation4], 64  }
 0x14a   :  { %752 = vsyncadd [#allocation4], 4294967232 }
 0x14b   :  { %617 = vsyncpa [#allocation3], 1 }
 0x14c   :  { %618 = vsyncpa [#allocation6], 1 }
 0x14d   :  { %619 = vsyncpa [#allocation4], 1 }

</bundles_post_ra>
